<compile_context>
chip_gen: v7x
topology: tpu7x:2x2x1
jax: 0.10.0
libtpu: 0.0.40
codegen_flags: <defaults>
</compile_context>

<pallas_src>
import functools
import math

import jax
import jax.numpy as jnp
from jax.experimental import pallas as pl
from jax.experimental.pallas import tpu as pltpu

SCALE = math.sqrt(0.5)  # torch.sqrt(torch.FloatTensor([0.5]))
_F32 = 4                # bytes per f32


# ----------------------------------------------------------------------------
# helpers
# ----------------------------------------------------------------------------
def _round_up(x, m):
    return ((x + m - 1) // m) * m


def _device_info():
    """Returns (vmem_capacity_bytes, tensorcores_per_device), conservatively."""
    vmem_cap = 64 * 1024 * 1024   # v7x-safe fallback
    n_cores = 1
    try:
        vmem_cap = int(pltpu.get_tpu_info().vmem_capacity_bytes)
    except Exception:
        pass
    try:
        n_cores = int(getattr(jax.devices()[0], "num_cores", 1) or 1)
    except Exception:
        pass
    return vmem_cap, max(1, n_cores)


# ----------------------------------------------------------------------------
# Tiled linear kernel: out = x @ W + b   (fc_out / vocab projection)
# ----------------------------------------------------------------------------
def _linear_kernel(x_ref, w_ref, b_ref, o_ref, acc_ref):
    @pl.when(pl.program_id(2) == 0)
    def _():
        acc_ref[...] = jnp.zeros_like(acc_ref)

    acc_ref[...] += jnp.dot(x_ref[...], w_ref[...],
                            preferred_element_type=jnp.float32)

    @pl.when(pl.program_id(2) == pl.num_programs(2) - 1)
    def _():
        o_ref[...] = (acc_ref[...] + b_ref[...]).astype(o_ref.dtype)


def linear(x, w, b, *, vmem_cap):
    """out = x @ w + b with a tiled, f32-accumulating Pallas matmul.

    The (K, N) weight (vocab projection) is the dominant HBM stream, so the
    grid is ordered (vocab-tile, row-tile, k-tile): each weight block is
    DMA'd exactly once; only the (small) activation block is re-streamed.
    N is padded to a multiple of 128 so output stores are unmasked vst.
    """
    M, K = x.shape
    N = w.shape[1]
    Mp = _round_up(M, 8)
    Np = _round_up(N, 128)
    if Np != N:
        w = jnp.pad(w, ((0, 0), (0, Np - N)))
        b = jnp.pad(b, ((0, 0), (0, Np - N)))
    if Mp != M:
        x = jnp.pad(x, ((0, Mp - M), (0, 0)))

    budget = int(vmem_cap * 0.55)
    # TODO(synk): also tile K for very large emb_dim; here K = emb_dim is modest.
    tk = K

    def fits(tm, tn):
        # double-buffered x / w / out blocks + f32 accumulator + bias
        return _F32 * (2 * tm * tk + 2 * tk * tn + 3 * tm * tn + 2 * tn) <= budget

    tm_cands = [d for d in range(Mp, 7, -8) if Mp % d == 0]     # multiples of 8
    tn_cands = [c for c in (2048, 1024, 512, 256, 128) if Np % c == 0]
    tm, tn = tm_cands[-1], tn_cands[-1]                         # safe fallback
    done = False
    for tnc in tn_cands:               # widest lane-dense output tile first
        for tmc in tm_cands:           # tallest row tile first
            if fits(tmc, tnc):
                tm, tn = tmc, tnc
                done = True
                break
        if done:
            break

    out = pl.pallas_call(
        _linear_kernel,
        grid=(Np // tn, Mp // tm, K // tk),
        in_specs=[
            pl.BlockSpec((tm, tk), lambda j, i, kk: (i, kk)),
            pl.BlockSpec((tk, tn), lambda j, i, kk: (kk, j)),
            pl.BlockSpec((1, tn), lambda j, i, kk: (0, j)),
        ],
        out_specs=pl.BlockSpec((tm, tn), lambda j, i, kk: (i, j)),
        out_shape=jax.ShapeDtypeStruct((Mp, Np), jnp.float32),
        scratch_shapes=[pltpu.VMEM((tm, tn), jnp.float32)],
        compiler_params=pltpu.CompilerParams(
            dimension_semantics=("parallel", "parallel", "arbitrary"),
            vmem_limit_bytes=int(vmem_cap) * 7 // 8),
    )(x, w, b)
    return out[:M, :N]


# ----------------------------------------------------------------------------
# Fused decoder kernel.  Grid = (batch_blocks, n_layers); the layer axis is
# trailing and "arbitrary" so the conv input stays resident in VMEM scratch.
# ----------------------------------------------------------------------------
def _fused_decoder_kernel(
    emb_ref,        # (BB, T, E)        token + positional embedding
    encct_ref,      # (BB, E, S_pad)    encoder_conved, pre-transposed & padded
    encm_ref,       # (BB, S_pad, E)    encoder_combined, padded
    convw_ref,      # (L*k or k, H, 2H) conv weights (tap-major)
    convb_ref,      # (L or 1, 1, 2H)   conv biases
    emb2hid_w_ref,  # (E, H)
    emb2hid_b_ref,  # (1, H)
    ah2e_w_ref,     # (H, E)            attn_hid2emb
    ah2e_b_ref,     # (1, E)
    ae2h_w_ref,     # (E, H)            attn_emb2hid
    ae2h_b_ref,     # (1, H)
    hid2emb_w_ref,  # (H, E)
    hid2emb_b_ref,  # (1, E)
    attn_ref,       # out (BB, T, S_pad)  attention of the last layer
    out_ref,        # out (BB, T, E)      hid2emb(final conv_input)
    x_sc,           # scratch (BB, T+k-1, H) f32 -- padded conv input, layer-resident
    *, k, pad_val, s_valid, conv_resident,
):
    BB, T, E = emb_ref.shape
    H = emb2hid_w_ref.shape[1]
    S_pad = encct_ref.shape[2]

    l = pl.program_id(1)
    n_layers = pl.num_programs(1)

    # ---- layer 0: pad rows written once + fused emb2hid projection ----------
    @pl.when(l == 0)
    def _():
        if k > 1:
            x_sc[:, :k - 1, :] = jnp.full((BB, k - 1, H), pad_val, jnp.float32)
        emb_flat = emb_ref[...].reshape(BB * T, E)
        x0 = jnp.dot(emb_flat, emb2hid_w_ref[...],
                     preferred_element_type=jnp.float32) + emb2hid_b_ref[...]
        x_sc[:, k - 1:, :] = x0.reshape(BB, T, H)

    # conv weights: resident -> index layer l dynamically; streamed -> layer 0
    li = l if conv_resident else 0
    b_l = convb_ref[li]                                     # (1, 2H)

    # ---- causal conv1d: k accumulated matmuls over shifted scratch windows --
    conv = None
    x_flat = None                                            # window j == k-1 is x itself
    for j in range(k):
        win = x_sc[:, j:j + T, :].reshape(BB * T, H)
        if j == k - 1:
            x_flat = win
        d = jnp.dot(win, convw_ref[li * k + j],
                    preferred_element_type=jnp.float32)
        conv = d if conv is None else conv + d
    conv = conv + b_l                                        # (BB*T, 2H)

    # ---- GLU -----------------------------------------------------------------
    glu = conv[:, :H] * jax.nn.sigmoid(conv[:, H:])          # (BB*T, H)

    # ---- attention ------------------------------------------------------------
    conved_emb = jnp.dot(glu, ah2e_w_ref[...],
                         preferred_element_type=jnp.float32) + ah2e_b_ref[...]
    combined = (conved_emb.reshape(BB, T, E) + emb_ref[...]) * SCALE   # (BB,T,E)

    # energy: (BB,T,E) x (BB,E,S_pad) -> (BB,T,S_pad); encoder pre-transposed
    energy = jax.lax.dot_general(
        combined, encct_ref[...],
        dimension_numbers=(((2,), (1,)), ((0,), (0,))),
        preferred_element_type=jnp.float32)
    if s_valid < S_pad:                                      # mask padded columns
        col = jax.lax.broadcasted_iota(jnp.int32, energy.shape, 2)
        energy = jnp.where(col < s_valid, energy, jnp.float32(-1e30))
    m = jnp.max(energy, axis=-1, keepdims=True)
    p = jnp.exp(energy - m)
    attn = p * pl.reciprocal(jnp.sum(p, axis=-1, keepdims=True), approx=True)

    attended = jax.lax.dot_general(
        attn, encm_ref[...],
        dimension_numbers=(((2,), (1,)), ((0,), (0,))),
        preferred_element_type=jnp.float32).reshape(BB * T, E)
    attended = jnp.dot(attended, ae2h_w_ref[...],
                       preferred_element_type=jnp.float32) + ae2h_b_ref[...]

    attended_combined = (glu + attended) * SCALE
    new_x = (attended_combined + x_flat) * SCALE             # (BB*T, H)

    x_sc[:, k - 1:, :] = new_x.reshape(BB, T, H)

    # ---- last layer: emit attention and the fused hid2emb projection --------
    # NOTE: attn_ref/out_ref index maps are constant in l, so these blocks stay
    # resident in VMEM and are written back to HBM only after the last layer.
    # Do not change the grid order or the output index maps without revisiting
    # this pl.when.
    @pl.when(l == n_layers - 1)
    def _():
        attn_ref[...] = attn.astype(attn_ref.dtype)
        out = jnp.dot(new_x, hid2emb_w_ref[...],
                      preferred_element_type=jnp.float32) + hid2emb_b_ref[...]
        out_ref[...] = out.reshape(BB, T, E).astype(out_ref.dtype)


# ----------------------------------------------------------------------------
# Full decoder forward
# ----------------------------------------------------------------------------
def decoder_forward(trg, encoder_conved, encoder_combined, params,
                    *, kernel_size, trg_pad_idx):
    B, T = trg.shape
    E = params["tok_emb"].shape[1]
    H = params["emb2hid_w"].shape[1]
    S = encoder_conved.shape[1]
    L = len(params["convs"])
    k = kernel_size

    vmem_cap, n_cores = _device_info()
    vmem_limit = int(vmem_cap) * 7 // 8
    budget = int(vmem_cap * 0.55)

    # TODO(synk): embedding gather (tok/pos) is left to XLA; a Pallas version
    # would need per-row DMA gather which is not worth it here.
    tok_emb = jnp.take(params["tok_emb"], trg, axis=0)          # (B, T, E)
    pos_emb = params["pos_emb"][:T]                             # (T, E)
    emb = (tok_emb + pos_emb[None, :, :]).astype(jnp.float32)   # (B, T, E)
    # dropout: identity (eval)

    # Lane-dense encoder length: pad S to a multiple of 128 (masked in-kernel).
    S_pad = _round_up(S, 128)
    enc_c_t = jnp.swapaxes(encoder_conved, 1, 2).astype(jnp.float32)   # (B, E, S)
    enc_m = encoder_combined.astype(jnp.float32)                       # (B, S, E)
    if S_pad != S:
        enc_c_t = jnp.pad(enc_c_t, ((0, 0), (0, 0), (0, S_pad - S)))
        enc_m = jnp.pad(enc_m, ((0, 0), (0, S_pad - S), (0, 0)))

    # Stacked tap-major conv weights (L*k, H, 2H) and biases (L, 1, 2H).
    conv_w = jnp.concatenate([lyr["w"] for lyr in params["convs"]], axis=0)
    conv_b = jnp.stack([lyr["b"] for lyr in params["convs"]])
    conv_bytes = (conv_w.size + conv_b.size) * _F32

    # -------- VMEM-budget-driven batch-block size & conv-weight residency ----
    def fused_bytes(bb, resident):
        io = 2 * bb * T * E * _F32                      # emb (double-buffered)
        io += 2 * bb * E * S_pad * _F32                 # encoder_conved^T
        io += 2 * bb * S_pad * E * _F32                 # encoder_combined
        io += 2 * bb * T * S_pad * _F32                 # attn output block
        io += 2 * bb * T * E * _F32                     # conved output block
        wts = conv_bytes if resident else 2 * (k * H * 2 * H + 2 * H) * _F32
        wts += 2 * (2 * E * H + 2 * H * E + 2 * (E + H) * 2) * _F32  # shared w + b
        sc = bb * (T + k - 1) * H * _F32                # x_sc scratch
        tmp = bb * T * (4 * H + 2 * S_pad + 2 * E + k * H) * _F32    # temporaries
        return io + wts + sc + tmp

    conv_resident = (conv_bytes <= budget // 3) and (fused_bytes(1, True) <= budget)
    divisors = [d for d in range(B, 0, -1) if B % d == 0]
    BB = 1
    for d in divisors:                                  # biggest block that fits
        if fused_bytes(d, conv_resident) <= budget:
            BB = d
            break
    if n_cores > 1:                                     # v7x: keep both TCs busy
        while B // BB < n_cores:
            smaller = [d for d in divisors if d < BB]
            if not smaller:
                break
            BB = smaller[0]
    nb = B // BB

    if conv_resident:
        conv_w_spec = pl.BlockSpec((L * k, H, 2 * H), lambda b, l: (0, 0, 0))
        conv_b_spec = pl.BlockSpec((L, 1, 2 * H), lambda b, l: (0, 0, 0))
    else:
        conv_w_spec = pl.BlockSpec((k, H, 2 * H), lambda b, l: (l, 0, 0))
        conv_b_spec = pl.BlockSpec((1, 1, 2 * H), lambda b, l: (l, 0, 0))

    kernel = functools.partial(_fused_decoder_kernel,
                               k=k, pad_val=float(trg_pad_idx),
                               s_valid=S, conv_resident=conv_resident)

    attn_p, conved_emb = pl.pallas_call(
        kernel,
        grid=(nb, L),
        in_specs=[
            pl.BlockSpec((BB, T, E), lambda b, l: (b, 0, 0)),        # emb
            pl.BlockSpec((BB, E, S_pad), lambda b, l: (b, 0, 0)),    # enc_conved^T
            pl.BlockSpec((BB, S_pad, E), lambda b, l: (b, 0, 0)),    # enc_combined
            conv_w_spec,                                             # conv weights
            conv_b_spec,                                             # conv biases
            pl.BlockSpec((E, H), lambda b, l: (0, 0)),               # emb2hid w
            pl.BlockSpec((1, H), lambda b, l: (0, 0)),               # emb2hid b
            pl.BlockSpec((H, E), lambda b, l: (0, 0)),               # attn_hid2emb w
            pl.BlockSpec((1, E), lambda b, l: (0, 0)),               # attn_hid2emb b
            pl.BlockSpec((E, H), lambda b, l: (0, 0)),               # attn_emb2hid w
            pl.BlockSpec((1, H), lambda b, l: (0, 0)),               # attn_emb2hid b
            pl.BlockSpec((H, E), lambda b, l: (0, 0)),               # hid2emb w
            pl.BlockSpec((1, E), lambda b, l: (0, 0)),               # hid2emb b
        ],
        out_specs=(
            pl.BlockSpec((BB, T, S_pad), lambda b, l: (b, 0, 0)),
            pl.BlockSpec((BB, T, E), lambda b, l: (b, 0, 0)),
        ),
        out_shape=(
            jax.ShapeDtypeStruct((B, T, S_pad), jnp.float32),
            jax.ShapeDtypeStruct((B, T, E), jnp.float32),
        ),
        scratch_shapes=[pltpu.VMEM((BB, T + k - 1, H), jnp.float32)],
        compiler_params=pltpu.CompilerParams(
            dimension_semantics=("parallel", "arbitrary"),
            vmem_limit_bytes=vmem_limit),
    )(emb, enc_c_t, enc_m, conv_w, conv_b,
      params["emb2hid_w"], params["emb2hid_b"],
      params["attn_hid2emb_w"], params["attn_hid2emb_b"],
      params["attn_emb2hid_w"], params["attn_emb2hid_b"],
      params["hid2emb_w"], params["hid2emb_b"])

    attn = attn_p[:, :, :S]

    # vocab projection: tiled / pipelined Pallas matmul (weight streamed once)
    logits = linear(conved_emb.reshape(B * T, E),
                    params["fc_out_w"], params["fc_out_b"], vmem_cap=vmem_cap)
    V = params["fc_out_w"].shape[1]
    return logits.reshape(B, T, V), attn


# ----------------------------------------------------------------------------
# Pure-JAX reference (same math) for the correctness check
# ----------------------------------------------------------------------------
def decoder_forward_ref(trg, enc_c, enc_m, params, *, kernel_size, trg_pad_idx):
    B, T = trg.shape
    tok_emb = jnp.take(params["tok_emb"], trg, axis=0)
    pos_emb = jnp.take(params["pos_emb"], jnp.arange(T), axis=0)
    emb = tok_emb + pos_emb[None]
    x = emb @ params["emb2hid_w"] + params["emb2hid_b"]
    H = x.shape[-1]
    attn = None
    for layer in params["convs"]:
        pad = jnp.full((B, kernel_size - 1, H), float(trg_pad_idx), jnp.float32)
        xp = jnp.concatenate([pad, x], axis=1)
        conv = sum(
            xp[:, j: j + T, :] @ layer["w"][j] for j in range(kernel_size)
        ) + layer["b"]
        glu = conv[..., :H] * jax.nn.sigmoid(conv[..., H:])
        ce = glu @ params["attn_hid2emb_w"] + params["attn_hid2emb_b"]
        comb = (ce + emb) * SCALE
        energy = jnp.einsum("bte,bse->bts", comb, enc_c)
        attn = jax.nn.softmax(energy, axis=-1)
        att = jnp.einsum("bts,bse->bte", attn, enc_m)
        att = att @ params["attn_emb2hid_w"] + params["attn_emb2hid_b"]
        ac = (glu + att) * SCALE
        x = (ac + x) * SCALE
    out = x @ params["hid2emb_w"] + params["hid2emb_b"]
    out = out @ params["fc_out_w"] + params["fc_out_b"]
    return out, attn


# ----------------------------------------------------------------------------
def make_params(key, *, output_dim, emb_dim, hid_dim, n_layer, kernel_size,
                max_length):
    ks = jax.random.split(key, 16 + 2 * n_layer)
    s = 0.1
    p = {
        "tok_emb": jax.random.normal(ks[0], (output_dim, emb_dim)) * s,
        "pos_emb": jax.random.normal(ks[1], (max_length, emb_dim)) * s,
        "emb2hid_w": jax.random.normal(ks[2], (emb_dim, hid_dim)) * s,
        "emb2hid_b": jax.random.normal(ks[3], (1, hid_dim)) * s,
        "hid2emb_w": jax.random.normal(ks[4], (hid_dim, emb_dim)) * s,
        "hid2emb_b": jax.random.normal(ks[5], (1, emb_dim)) * s,
        "attn_hid2emb_w": jax.random.normal(ks[6], (hid_dim, emb_dim)) * s,
        "attn_hid2emb_b": jax.random.normal(ks[7], (1, emb_dim)) * s,
        "attn_emb2hid_w": jax.random.normal(ks[8], (emb_dim, hid_dim)) * s,
        "attn_emb2hid_b": jax.random.normal(ks[9], (1, hid_dim)) * s,
        "fc_out_w": jax.random.normal(ks[10], (emb_dim, output_dim)) * s,
        "fc_out_b": jax.random.normal(ks[11], (1, output_dim)) * s,
        "convs": [],
    }
    for i in range(n_layer):
        # tap-major layout (k, H, 2H); equals PyTorch (2H, H, k).transpose(2,1,0)
        p["convs"].append({
            "w": jax.random.normal(
                ks[16 + 2 * i], (kernel_size, hid_dim, 2 * hid_dim)) * s,
            "b": jax.random.normal(ks[17 + 2 * i], (1, 2 * hid_dim)) * s,
        })
    return jax.tree_util.tree_map(lambda a: a.astype(jnp.float32), p)


if __name__ == "__main__":
    # small shapes consistent with the module
    B, T, S = 2, 8, 16           # batch, target len, encoder len
    E, H = 32, 32                # emb_dim, hid_dim
    V = 40                       # output_dim (vocab)
    K = 3                        # kernel_size
    N_LAYER = 2
    PAD_IDX = 1
    MAX_LEN = 100

    key = jax.random.PRNGKey(0)
    kp, kt, ke1, ke2 = jax.random.split(key, 4)

    params = make_params(kp, output_dim=V, emb_dim=E, hid_dim=H,
                         n_layer=N_LAYER, kernel_size=K, max_length=MAX_LEN)

    trg = jax.random.randint(kt, (B, T), 0, V, dtype=jnp.int32)
    encoder_conved = jax.random.normal(ke1, (B, S, E), dtype=jnp.float32)
    encoder_combined = jax.random.normal(ke2, (B, S, E), dtype=jnp.float32)

    fwd = jax.jit(functools.partial(decoder_forward,
                                    kernel_size=K, trg_pad_idx=PAD_IDX))
    out, attn = fwd(trg, encoder_conved, encoder_combined, params)
    out = jax.block_until_ready(out)
    attn = jax.block_until_ready(attn)

    # correctness check vs pure-JAX reference (tolerances account for the
    # approx EUP reciprocal in the softmax normalization)
    out_ref, attn_ref = decoder_forward_ref(trg, encoder_conved,
                                            encoder_combined, params,
                                            kernel_size=K,
                                            trg_pad_idx=PAD_IDX)
    assert out.shape == (B, T, V) and attn.shape == (B, T, S)
    assert jnp.allclose(out, out_ref, atol=5e-3, rtol=5e-3)
    assert jnp.allclose(attn, attn_ref, atol=2e-3, rtol=2e-2)

    print("KERNEL_OK")
</pallas_src>

<mosaic_0001>
module attributes {stable_mosaic.version = 11 : i64} {
  func.func @_fused_decoder_kernel(%arg0: i32, %arg1: i32, %arg2: memref<2x8x32xf32, #tpu.memory_space<vmem>>, %arg3: memref<2x32x128xf32, #tpu.memory_space<vmem>>, %arg4: memref<2x128x32xf32, #tpu.memory_space<vmem>>, %arg5: memref<6x32x64xf32, #tpu.memory_space<vmem>>, %arg6: memref<2x1x64xf32, #tpu.memory_space<vmem>>, %arg7: memref<32x32xf32, #tpu.memory_space<vmem>>, %arg8: memref<1x32xf32, #tpu.memory_space<vmem>>, %arg9: memref<32x32xf32, #tpu.memory_space<vmem>>, %arg10: memref<1x32xf32, #tpu.memory_space<vmem>>, %arg11: memref<32x32xf32, #tpu.memory_space<vmem>>, %arg12: memref<1x32xf32, #tpu.memory_space<vmem>>, %arg13: memref<32x32xf32, #tpu.memory_space<vmem>>, %arg14: memref<1x32xf32, #tpu.memory_space<vmem>>, %arg15: memref<2x8x128xf32, #tpu.memory_space<vmem>>, %arg16: memref<2x8x32xf32, #tpu.memory_space<vmem>>, %arg17: memref<2x10x32xf32, #tpu.memory_space<vmem>>) attributes {dimension_semantics = [#tpu.dimension_semantics<parallel>, #tpu.dimension_semantics<arbitrary>], iteration_bounds = array<i64: 1, 2>, scalar_prefetch = 0 : i64, scratch_operands = 1 : i64, tpu.core_type = #tpu.core_type<tc>, window_params = [{transform_indices = @transform_0, window_bounds = array<i64: 2, 8, 32>}, {transform_indices = @transform_1, window_bounds = array<i64: 2, 32, 128>}, {transform_indices = @transform_2, window_bounds = array<i64: 2, 128, 32>}, {pipeline_mode = #tpu.pipeline_mode<synchronous>, transform_indices = @transform_3, window_bounds = array<i64: 6, 32, 64>}, {pipeline_mode = #tpu.pipeline_mode<synchronous>, transform_indices = @transform_4, window_bounds = array<i64: 2, 1, 64>}, {pipeline_mode = #tpu.pipeline_mode<synchronous>, transform_indices = @transform_5, window_bounds = array<i64: 32, 32>}, {pipeline_mode = #tpu.pipeline_mode<synchronous>, transform_indices = @transform_6, window_bounds = array<i64: 1, 32>}, {pipeline_mode = #tpu.pipeline_mode<synchronous>, transform_indices = @transform_7, window_bounds = array<i64: 32, 32>}, {pipeline_mode = #tpu.pipeline_mode<synchronous>, transform_indices = @transform_8, window_bounds = array<i64: 1, 32>}, {pipeline_mode = #tpu.pipeline_mode<synchronous>, transform_indices = @transform_9, window_bounds = array<i64: 32, 32>}, {pipeline_mode = #tpu.pipeline_mode<synchronous>, transform_indices = @transform_10, window_bounds = array<i64: 1, 32>}, {pipeline_mode = #tpu.pipeline_mode<synchronous>, transform_indices = @transform_11, window_bounds = array<i64: 32, 32>}, {pipeline_mode = #tpu.pipeline_mode<synchronous>, transform_indices = @transform_12, window_bounds = array<i64: 1, 32>}, {transform_indices = @transform_13, window_bounds = array<i64: 2, 8, 128>}, {transform_indices = @transform_14, window_bounds = array<i64: 2, 8, 32>}]} {
    %c0_i32 = arith.constant 0 : i32
    %0 = arith.cmpi eq, %arg1, %c0_i32 : i32
    %1 = arith.extui %0 : i1 to i32
    %c0_i32_0 = arith.constant 0 : i32
    %2 = arith.cmpi ne, %1, %c0_i32_0 : i32
    scf.if %2 {
      %cst_53 = arith.constant 1.000000e+00 : f32
      %88 = vector.broadcast %cst_53 : f32 to vector<2x2x32xf32>
      %c0_54 = arith.constant 0 : index
      %c0_55 = arith.constant 0 : index
      %c0_56 = arith.constant 0 : index
      %89 = vector.load %arg17[%c0_54, %c0_55, %c0_56] : memref<2x10x32xf32, #tpu.memory_space<vmem>>, vector<2x2x32xf32>
      tpu.vector_store %arg17[%c0_54, %c0_55, %c0_56], %88 {strides = array<i32>} : memref<2x10x32xf32, #tpu.memory_space<vmem>>, vector<2x2x32xf32>,
      %c0_57 = arith.constant 0 : index
      %c0_58 = arith.constant 0 : index
      %c0_59 = arith.constant 0 : index
      %90 = vector.load %arg2[%c0_57, %c0_58, %c0_59] : memref<2x8x32xf32, #tpu.memory_space<vmem>>, vector<2x8x32xf32>
      %91 = vector.shape_cast %90 : vector<2x8x32xf32> to vector<16x32xf32>
      %c0_60 = arith.constant 0 : index
      %c0_61 = arith.constant 0 : index
      %92 = vector.load %arg7[%c0_60, %c0_61] : memref<32x32xf32, #tpu.memory_space<vmem>>, vector<32x32xf32>
      %cst_62 = arith.constant dense<0.000000e+00> : vector<16x32xf32>
      %93 = tpu.matmul %91, %92, %cst_62 {dimension_numbers = #tpu.dot_dimension_numbers<[1], [0], [0], [1], [0, 0, 1, 1], [], []>} : vector<16x32xf32>, vector<32x32xf32>, vector<16x32xf32> -> vector<16x32xf32>
      %c0_63 = arith.constant 0 : index
      %c0_64 = arith.constant 0 : index
      %94 = vector.load %arg8[%c0_63, %c0_64] : memref<1x32xf32, #tpu.memory_space<vmem>>, vector<1x32xf32>
      %95 = vector.broadcast %94 : vector<1x32xf32> to vector<16x32xf32>
      %96 = arith.addf %93, %95 : vector<16x32xf32>
      %97 = vector.shape_cast %96 : vector<16x32xf32> to vector<2x8x32xf32>
      %c0_65 = arith.constant 0 : index
      %c2_66 = arith.constant 2 : index
      %c0_67 = arith.constant 0 : index
      %98 = vector.load %arg17[%c0_65, %c2_66, %c0_67] : memref<2x10x32xf32, #tpu.memory_space<vmem>>, vector<2x8x32xf32>
      tpu.vector_store %arg17[%c0_65, %c2_66, %c0_67], %97 {strides = array<i32>} : memref<2x10x32xf32, #tpu.memory_space<vmem>>, vector<2x8x32xf32>,
    } else {
    }
    %3 = arith.index_cast %arg1 : i32 to index
    %c0 = arith.constant 0 : index
    %c0_1 = arith.constant 0 : index
    %4 = vector.load %arg6[%3, %c0, %c0_1] : memref<2x1x64xf32, #tpu.memory_space<vmem>>, vector<1x1x64xf32>
    %5 = vector.shape_cast %4 : vector<1x1x64xf32> to vector<1x64xf32>
    %c0_2 = arith.constant 0 : index
    %c0_3 = arith.constant 0 : index
    %c0_4 = arith.constant 0 : index
    %6 = vector.load %arg17[%c0_2, %c0_3, %c0_4] : memref<2x10x32xf32, #tpu.memory_space<vmem>>, vector<2x8x32xf32>
    %7 = vector.shape_cast %6 : vector<2x8x32xf32> to vector<16x32xf32>
    %c3_i32 = arith.constant 3 : i32
    %8 = arith.muli %arg1, %c3_i32 : i32
    %c0_i32_5 = arith.constant 0 : i32
    %9 = arith.addi %8, %c0_i32_5 : i32
    %10 = arith.index_cast %9 : i32 to index
    %c0_6 = arith.constant 0 : index
    %c0_7 = arith.constant 0 : index
    %11 = vector.load %arg5[%10, %c0_6, %c0_7] : memref<6x32x64xf32, #tpu.memory_space<vmem>>, vector<1x32x64xf32>
    %12 = vector.shape_cast %11 : vector<1x32x64xf32> to vector<32x64xf32>
    %cst = arith.constant dense<0.000000e+00> : vector<16x64xf32>
    %13 = tpu.matmul %7, %12, %cst {dimension_numbers = #tpu.dot_dimension_numbers<[1], [0], [0], [1], [0, 0, 1, 1], [], []>} : vector<16x32xf32>, vector<32x64xf32>, vector<16x64xf32> -> vector<16x64xf32>
    %c0_8 = arith.constant 0 : index
    %c1 = arith.constant 1 : index
    %c0_9 = arith.constant 0 : index
    %14 = vector.load %arg17[%c0_8, %c1, %c0_9] : memref<2x10x32xf32, #tpu.memory_space<vmem>>, vector<2x8x32xf32>
    %15 = vector.shape_cast %14 : vector<2x8x32xf32> to vector<16x32xf32>
    %c3_i32_10 = arith.constant 3 : i32
    %16 = arith.muli %arg1, %c3_i32_10 : i32
    %c1_i32 = arith.constant 1 : i32
    %17 = arith.addi %16, %c1_i32 : i32
    %18 = arith.index_cast %17 : i32 to index
    %c0_11 = arith.constant 0 : index
    %c0_12 = arith.constant 0 : index
    %19 = vector.load %arg5[%18, %c0_11, %c0_12] : memref<6x32x64xf32, #tpu.memory_space<vmem>>, vector<1x32x64xf32>
    %20 = vector.shape_cast %19 : vector<1x32x64xf32> to vector<32x64xf32>
    %cst_13 = arith.constant dense<0.000000e+00> : vector<16x64xf32>
    %21 = tpu.matmul %15, %20, %cst_13 {dimension_numbers = #tpu.dot_dimension_numbers<[1], [0], [0], [1], [0, 0, 1, 1], [], []>} : vector<16x32xf32>, vector<32x64xf32>, vector<16x64xf32> -> vector<16x64xf32>
    %22 = arith.addf %13, %21 : vector<16x64xf32>
    %c0_14 = arith.constant 0 : index
    %c2 = arith.constant 2 : index
    %c0_15 = arith.constant 0 : index
    %23 = vector.load %arg17[%c0_14, %c2, %c0_15] : memref<2x10x32xf32, #tpu.memory_space<vmem>>, vector<2x8x32xf32>
    %24 = vector.shape_cast %23 : vector<2x8x32xf32> to vector<16x32xf32>
    %c3_i32_16 = arith.constant 3 : i32
    %25 = arith.muli %arg1, %c3_i32_16 : i32
    %c2_i32 = arith.constant 2 : i32
    %26 = arith.addi %25, %c2_i32 : i32
    %27 = arith.index_cast %26 : i32 to index
    %c0_17 = arith.constant 0 : index
    %c0_18 = arith.constant 0 : index
    %28 = vector.load %arg5[%27, %c0_17, %c0_18] : memref<6x32x64xf32, #tpu.memory_space<vmem>>, vector<1x32x64xf32>
    %29 = vector.shape_cast %28 : vector<1x32x64xf32> to vector<32x64xf32>
    %cst_19 = arith.constant dense<0.000000e+00> : vector<16x64xf32>
    %30 = tpu.matmul %24, %29, %cst_19 {dimension_numbers = #tpu.dot_dimension_numbers<[1], [0], [0], [1], [0, 0, 1, 1], [], []>} : vector<16x32xf32>, vector<32x64xf32>, vector<16x64xf32> -> vector<16x64xf32>
    %31 = arith.addf %22, %30 : vector<16x64xf32>
    %32 = vector.broadcast %5 : vector<1x64xf32> to vector<16x64xf32>
    %33 = arith.addf %31, %32 : vector<16x64xf32>
    %34 = vector.extract_strided_slice %33 {offsets = [0, 0], sizes = [16, 32], strides = [1, 1]} : vector<16x64xf32> to vector<16x32xf32>
    %35 = vector.extract_strided_slice %33 {offsets = [0, 32], sizes = [16, 32], strides = [1, 1]} : vector<16x64xf32> to vector<16x32xf32>
    %36 = arith.negf %35 : vector<16x32xf32>
    %37 = math.exp %36 : vector<16x32xf32>
    %cst_20 = arith.constant 1.000000e+00 : f32
    %38 = vector.broadcast %cst_20 : f32 to vector<16x32xf32>
    %39 = arith.addf %38, %37 : vector<16x32xf32>
    %40 = arith.divf %38, %39 : vector<16x32xf32>
    %41 = arith.mulf %34, %40 : vector<16x32xf32>
    %c0_21 = arith.constant 0 : index
    %c0_22 = arith.constant 0 : index
    %42 = vector.load %arg9[%c0_21, %c0_22] : memref<32x32xf32, #tpu.memory_space<vmem>>, vector<32x32xf32>
    %cst_23 = arith.constant dense<0.000000e+00> : vector<16x32xf32>
    %43 = tpu.matmul %41, %42, %cst_23 {dimension_numbers = #tpu.dot_dimension_numbers<[1], [0], [0], [1], [0, 0, 1, 1], [], []>} : vector<16x32xf32>, vector<32x32xf32>, vector<16x32xf32> -> vector<16x32xf32>
    %c0_24 = arith.constant 0 : index
    %c0_25 = arith.constant 0 : index
    %44 = vector.load %arg10[%c0_24, %c0_25] : memref<1x32xf32, #tpu.memory_space<vmem>>, vector<1x32xf32>
    %45 = vector.broadcast %44 : vector<1x32xf32> to vector<16x32xf32>
    %46 = arith.addf %43, %45 : vector<16x32xf32>
    %47 = vector.shape_cast %46 : vector<16x32xf32> to vector<2x8x32xf32>
    %c0_26 = arith.constant 0 : index
    %c0_27 = arith.constant 0 : index
    %c0_28 = arith.constant 0 : index
    %48 = vector.load %arg2[%c0_26, %c0_27, %c0_28] : memref<2x8x32xf32, #tpu.memory_space<vmem>>, vector<2x8x32xf32>
    %49 = arith.addf %47, %48 : vector<2x8x32xf32>
    %cst_29 = arith.constant 0.707106769 : f32
    %50 = vector.broadcast %cst_29 : f32 to vector<2x8x32xf32>
    %51 = arith.mulf %49, %50 : vector<2x8x32xf32>
    %c0_30 = arith.constant 0 : index
    %c0_31 = arith.constant 0 : index
    %c0_32 = arith.constant 0 : index
    %52 = vector.load %arg3[%c0_30, %c0_31, %c0_32] : memref<2x32x128xf32, #tpu.memory_space<vmem>>, vector<2x32x128xf32>
    %cst_33 = arith.constant dense<0.000000e+00> : vector<2x8x128xf32>
    %53 = tpu.matmul %51, %52, %cst_33 {dimension_numbers = #tpu.dot_dimension_numbers<[2], [1], [1], [2], [0, 0, 0, 1, 1, 2], [0], [0]>} : vector<2x8x32xf32>, vector<2x32x128xf32>, vector<2x8x128xf32> -> vector<2x8x128xf32>
    %54 = tpu.iota {dimensions = array<i32: 2>} : vector<2x8x128xi32>
    %c16_i32 = arith.constant 16 : i32
    %55 = vector.broadcast %c16_i32 : i32 to vector<2x8x128xi32>
    %56 = arith.cmpi slt, %54, %55 : vector<2x8x128xi32>
    %cst_34 = arith.constant -1.000000e+30 : f32
    %57 = vector.broadcast %cst_34 : f32 to vector<2x8x128xf32>
    %58 = arith.select %56, %53, %57 : vector<2x8x128xi1>, vector<2x8x128xf32>
    %cst_35 = arith.constant dense<0xFF800000> : vector<2x8xf32>
    %59 = vector.multi_reduction <maximumf>, %58, %cst_35 [2] : vector<2x8x128xf32> to vector<2x8xf32>
    %60 = vector.shape_cast %59 : vector<2x8xf32> to vector<2x8x1xf32>
    %61 = vector.broadcast %60 : vector<2x8x1xf32> to vector<2x8x128xf32>
    %62 = arith.subf %58, %61 : vector<2x8x128xf32>
    %63 = math.exp %62 : vector<2x8x128xf32>
    %cst_36 = arith.constant dense<0.000000e+00> : vector<2x8xf32>
    %64 = vector.multi_reduction <add>, %63, %cst_36 [2] : vector<2x8x128xf32> to vector<2x8xf32>
    %65 = vector.shape_cast %64 : vector<2x8xf32> to vector<2x8x1xf32>
    %66 = tpu.reciprocal %65 {approx = true} : vector<2x8x1xf32> -> vector<2x8x1xf32>
    %67 = vector.broadcast %66 : vector<2x8x1xf32> to vector<2x8x128xf32>
    %68 = arith.mulf %63, %67 : vector<2x8x128xf32>
    %c0_37 = arith.constant 0 : index
    %c0_38 = arith.constant 0 : index
    %c0_39 = arith.constant 0 : index
    %69 = vector.load %arg4[%c0_37, %c0_38, %c0_39] : memref<2x128x32xf32, #tpu.memory_space<vmem>>, vector<2x128x32xf32>
    %cst_40 = arith.constant dense<0.000000e+00> : vector<2x8x32xf32>
    %70 = tpu.matmul %68, %69, %cst_40 {dimension_numbers = #tpu.dot_dimension_numbers<[2], [1], [1], [2], [0, 0, 0, 1, 1, 2], [0], [0]>} : vector<2x8x128xf32>, vector<2x128x32xf32>, vector<2x8x32xf32> -> vector<2x8x32xf32>
    %71 = vector.shape_cast %70 : vector<2x8x32xf32> to vector<16x32xf32>
    %c0_41 = arith.constant 0 : index
    %c0_42 = arith.constant 0 : index
    %72 = vector.load %arg11[%c0_41, %c0_42] : memref<32x32xf32, #tpu.memory_space<vmem>>, vector<32x32xf32>
    %cst_43 = arith.constant dense<0.000000e+00> : vector<16x32xf32>
    %73 = tpu.matmul %71, %72, %cst_43 {dimension_numbers = #tpu.dot_dimension_numbers<[1], [0], [0], [1], [0, 0, 1, 1], [], []>} : vector<16x32xf32>, vector<32x32xf32>, vector<16x32xf32> -> vector<16x32xf32>
    %c0_44 = arith.constant 0 : index
    %c0_45 = arith.constant 0 : index
    %74 = vector.load %arg12[%c0_44, %c0_45] : memref<1x32xf32, #tpu.memory_space<vmem>>, vector<1x32xf32>
    %75 = vector.broadcast %74 : vector<1x32xf32> to vector<16x32xf32>
    %76 = arith.addf %73, %75 : vector<16x32xf32>
    %77 = arith.addf %41, %76 : vector<16x32xf32>
    %cst_46 = arith.constant 0.707106769 : f32
    %78 = vector.broadcast %cst_46 : f32 to vector<16x32xf32>
    %79 = arith.mulf %77, %78 : vector<16x32xf32>
    %80 = arith.addf %79, %24 : vector<16x32xf32>
    %cst_47 = arith.constant 0.707106769 : f32
    %81 = vector.broadcast %cst_47 : f32 to vector<16x32xf32>
    %82 = arith.mulf %80, %81 : vector<16x32xf32>
    %83 = vector.shape_cast %82 : vector<16x32xf32> to vector<2x8x32xf32>
    %c0_48 = arith.constant 0 : index
    %c2_49 = arith.constant 2 : index
    %c0_50 = arith.constant 0 : index
    %84 = vector.load %arg17[%c0_48, %c2_49, %c0_50] : memref<2x10x32xf32, #tpu.memory_space<vmem>>, vector<2x8x32xf32>
    tpu.vector_store %arg17[%c0_48, %c2_49, %c0_50], %83 {strides = array<i32>} : memref<2x10x32xf32, #tpu.memory_space<vmem>>, vector<2x8x32xf32>,
    %c1_i32_51 = arith.constant 1 : i32
    %85 = arith.cmpi eq, %arg1, %c1_i32_51 : i32
    %86 = arith.extui %85 : i1 to i32
    %c0_i32_52 = arith.constant 0 : i32
    %87 = arith.cmpi ne, %86, %c0_i32_52 : i32
    scf.if %87 {
      %c0_53 = arith.constant 0 : index
      %c0_54 = arith.constant 0 : index
      %c0_55 = arith.constant 0 : index
      %88 = vector.load %arg15[%c0_53, %c0_54, %c0_55] : memref<2x8x128xf32, #tpu.memory_space<vmem>>, vector<2x8x128xf32>
      tpu.vector_store %arg15[%c0_53, %c0_54, %c0_55], %68 {strides = array<i32>} : memref<2x8x128xf32, #tpu.memory_space<vmem>>, vector<2x8x128xf32>,
      %c0_56 = arith.constant 0 : index
      %c0_57 = arith.constant 0 : index
      %89 = vector.load %arg13[%c0_56, %c0_57] : memref<32x32xf32, #tpu.memory_space<vmem>>, vector<32x32xf32>
      %cst_58 = arith.constant dense<0.000000e+00> : vector<16x32xf32>
      %90 = tpu.matmul %82, %89, %cst_58 {dimension_numbers = #tpu.dot_dimension_numbers<[1], [0], [0], [1], [0, 0, 1, 1], [], []>} : vector<16x32xf32>, vector<32x32xf32>, vector<16x32xf32> -> vector<16x32xf32>
      %c0_59 = arith.constant 0 : index
      %c0_60 = arith.constant 0 : index
      %91 = vector.load %arg14[%c0_59, %c0_60] : memref<1x32xf32, #tpu.memory_space<vmem>>, vector<1x32xf32>
      %92 = vector.broadcast %91 : vector<1x32xf32> to vector<16x32xf32>
      %93 = arith.addf %90, %92 : vector<16x32xf32>
      %94 = vector.shape_cast %93 : vector<16x32xf32> to vector<2x8x32xf32>
      %c0_61 = arith.constant 0 : index
      %c0_62 = arith.constant 0 : index
      %c0_63 = arith.constant 0 : index
      %95 = vector.load %arg16[%c0_61, %c0_62, %c0_63] : memref<2x8x32xf32, #tpu.memory_space<vmem>>, vector<2x8x32xf32>
      tpu.vector_store %arg16[%c0_61, %c0_62, %c0_63], %94 {strides = array<i32>} : memref<2x8x32xf32, #tpu.memory_space<vmem>>, vector<2x8x32xf32>,
    } else {
    }
    return
  }
  func.func @transform_0(%arg0: i32, %arg1: i32) -> (i32, i32, i32) {
    %c0_i32 = arith.constant 0 : i32
    %c0_i32_0 = arith.constant 0 : i32
    %c0_i32_1 = arith.constant 0 : i32
    return %arg0, %c0_i32, %c0_i32_0 : i32, i32, i32
  }
  func.func @transform_1(%arg0: i32, %arg1: i32) -> (i32, i32, i32) {
    %c0_i32 = arith.constant 0 : i32
    %c0_i32_0 = arith.constant 0 : i32
    %c0_i32_1 = arith.constant 0 : i32
    return %arg0, %c0_i32, %c0_i32_0 : i32, i32, i32
  }
  func.func @transform_2(%arg0: i32, %arg1: i32) -> (i32, i32, i32) {
    %c0_i32 = arith.constant 0 : i32
    %c0_i32_0 = arith.constant 0 : i32
    %c0_i32_1 = arith.constant 0 : i32
    return %arg0, %c0_i32, %c0_i32_0 : i32, i32, i32
  }
  func.func @transform_3(%arg0: i32, %arg1: i32) -> (i32, i32, i32) {
    %c0_i32 = arith.constant 0 : i32
    %c0_i32_0 = arith.constant 0 : i32
    %c0_i32_1 = arith.constant 0 : i32
    %c0_i32_2 = arith.constant 0 : i32
    return %c0_i32, %c0_i32_0, %c0_i32_1 : i32, i32, i32
  }
  func.func @transform_4(%arg0: i32, %arg1: i32) -> (i32, i32, i32) {
    %c0_i32 = arith.constant 0 : i32
    %c0_i32_0 = arith.constant 0 : i32
    %c0_i32_1 = arith.constant 0 : i32
    %c0_i32_2 = arith.constant 0 : i32
    return %c0_i32, %c0_i32_0, %c0_i32_1 : i32, i32, i32
  }
  func.func @transform_5(%arg0: i32, %arg1: i32) -> (i32, i32) {
    %c0_i32 = arith.constant 0 : i32
    %c0_i32_0 = arith.constant 0 : i32
    %c0_i32_1 = arith.constant 0 : i32
    return %c0_i32, %c0_i32_0 : i32, i32
  }
  func.func @transform_6(%arg0: i32, %arg1: i32) -> (i32, i32) {
    %c0_i32 = arith.constant 0 : i32
    %c0_i32_0 = arith.constant 0 : i32
    %c0_i32_1 = arith.constant 0 : i32
    return %c0_i32, %c0_i32_0 : i32, i32
  }
  func.func @transform_7(%arg0: i32, %arg1: i32) -> (i32, i32) {
    %c0_i32 = arith.constant 0 : i32
    %c0_i32_0 = arith.constant 0 : i32
    %c0_i32_1 = arith.constant 0 : i32
    return %c0_i32, %c0_i32_0 : i32, i32
  }
  func.func @transform_8(%arg0: i32, %arg1: i32) -> (i32, i32) {
    %c0_i32 = arith.constant 0 : i32
    %c0_i32_0 = arith.constant 0 : i32
    %c0_i32_1 = arith.constant 0 : i32
    return %c0_i32, %c0_i32_0 : i32, i32
  }
  func.func @transform_9(%arg0: i32, %arg1: i32) -> (i32, i32) {
    %c0_i32 = arith.constant 0 : i32
    %c0_i32_0 = arith.constant 0 : i32
    %c0_i32_1 = arith.constant 0 : i32
    return %c0_i32, %c0_i32_0 : i32, i32
  }
  func.func @transform_10(%arg0: i32, %arg1: i32) -> (i32, i32) {
    %c0_i32 = arith.constant 0 : i32
    %c0_i32_0 = arith.constant 0 : i32
    %c0_i32_1 = arith.constant 0 : i32
    return %c0_i32, %c0_i32_0 : i32, i32
  }
  func.func @transform_11(%arg0: i32, %arg1: i32) -> (i32, i32) {
    %c0_i32 = arith.constant 0 : i32
    %c0_i32_0 = arith.constant 0 : i32
    %c0_i32_1 = arith.constant 0 : i32
    return %c0_i32, %c0_i32_0 : i32, i32
  }
  func.func @transform_12(%arg0: i32, %arg1: i32) -> (i32, i32) {
    %c0_i32 = arith.constant 0 : i32
    %c0_i32_0 = arith.constant 0 : i32
    %c0_i32_1 = arith.constant 0 : i32
    return %c0_i32, %c0_i32_0 : i32, i32
  }
  func.func @transform_13(%arg0: i32, %arg1: i32) -> (i32, i32, i32) {
    %c0_i32 = arith.constant 0 : i32
    %c0_i32_0 = arith.constant 0 : i32
    %c0_i32_1 = arith.constant 0 : i32
    return %arg0, %c0_i32, %c0_i32_0 : i32, i32, i32
  }
  func.func @transform_14(%arg0: i32, %arg1: i32) -> (i32, i32, i32) {
    %c0_i32 = arith.constant 0 : i32
    %c0_i32_0 = arith.constant 0 : i32
    %c0_i32_1 = arith.constant 0 : i32
    return %arg0, %c0_i32, %c0_i32_0 : i32, i32, i32
  }
}

module attributes {stable_mosaic.version = 11 : i64} {
  func.func @_linear_kernel(%arg0: i32, %arg1: i32, %arg2: i32, %arg3: memref<16x32xf32, #tpu.memory_space<vmem>>, %arg4: memref<32x128xf32, #tpu.memory_space<vmem>>, %arg5: memref<1x128xf32, #tpu.memory_space<vmem>>, %arg6: memref<16x128xf32, #tpu.memory_space<vmem>>, %arg7: memref<16x128xf32, #tpu.memory_space<vmem>>) attributes {dimension_semantics = [#tpu.dimension_semantics<parallel>, #tpu.dimension_semantics<parallel>, #tpu.dimension_semantics<arbitrary>], iteration_bounds = array<i64: 1, 1, 1>, scalar_prefetch = 0 : i64, scratch_operands = 1 : i64, tpu.core_type = #tpu.core_type<tc>, window_params = [{transform_indices = @transform_0, window_bounds = array<i64: 16, 32>}, {transform_indices = @transform_1, window_bounds = array<i64: 32, 128>}, {transform_indices = @transform_2, window_bounds = array<i64: 1, 128>}, {transform_indices = @transform_3, window_bounds = array<i64: 16, 128>}]} {
    %c0_i32 = arith.constant 0 : i32
    %0 = arith.cmpi eq, %arg2, %c0_i32 : i32
    %1 = arith.extui %0 : i1 to i32
    %c0_i32_0 = arith.constant 0 : i32
    %2 = arith.cmpi ne, %1, %c0_i32_0 : i32
    scf.if %2 {
      %cst_10 = arith.constant 0.000000e+00 : f32
      %12 = vector.broadcast %cst_10 : f32 to vector<16x128xf32>
      %c0_11 = arith.constant 0 : index
      %c0_12 = arith.constant 0 : index
      %13 = vector.load %arg7[%c0_11, %c0_12] : memref<16x128xf32, #tpu.memory_space<vmem>>, vector<16x128xf32>
      tpu.vector_store %arg7[%c0_11, %c0_12], %12 {strides = array<i32>} : memref<16x128xf32, #tpu.memory_space<vmem>>, vector<16x128xf32>,
    } else {
    }
    %c0 = arith.constant 0 : index
    %c0_1 = arith.constant 0 : index
    %3 = vector.load %arg7[%c0, %c0_1] : memref<16x128xf32, #tpu.memory_space<vmem>>, vector<16x128xf32>
    %c0_2 = arith.constant 0 : index
    %c0_3 = arith.constant 0 : index
    %4 = vector.load %arg3[%c0_2, %c0_3] : memref<16x32xf32, #tpu.memory_space<vmem>>, vector<16x32xf32>
    %c0_4 = arith.constant 0 : index
    %c0_5 = arith.constant 0 : index
    %5 = vector.load %arg4[%c0_4, %c0_5] : memref<32x128xf32, #tpu.memory_space<vmem>>, vector<32x128xf32>
    %cst = arith.constant dense<0.000000e+00> : vector<16x128xf32>
    %6 = tpu.matmul %4, %5, %cst {dimension_numbers = #tpu.dot_dimension_numbers<[1], [0], [0], [1], [0, 0, 1, 1], [], []>} : vector<16x32xf32>, vector<32x128xf32>, vector<16x128xf32> -> vector<16x128xf32>
    %7 = arith.addf %3, %6 : vector<16x128xf32>
    %c0_6 = arith.constant 0 : index
    %c0_7 = arith.constant 0 : index
    %8 = vector.load %arg7[%c0_6, %c0_7] : memref<16x128xf32, #tpu.memory_space<vmem>>, vector<16x128xf32>
    tpu.vector_store %arg7[%c0_6, %c0_7], %7 {strides = array<i32>} : memref<16x128xf32, #tpu.memory_space<vmem>>, vector<16x128xf32>,
    %c0_i32_8 = arith.constant 0 : i32
    %9 = arith.cmpi eq, %arg2, %c0_i32_8 : i32
    %10 = arith.extui %9 : i1 to i32
    %c0_i32_9 = arith.constant 0 : i32
    %11 = arith.cmpi ne, %10, %c0_i32_9 : i32
    scf.if %11 {
      %c0_10 = arith.constant 0 : index
      %c0_11 = arith.constant 0 : index
      %12 = vector.load %arg7[%c0_10, %c0_11] : memref<16x128xf32, #tpu.memory_space<vmem>>, vector<16x128xf32>
      %c0_12 = arith.constant 0 : index
      %c0_13 = arith.constant 0 : index
      %13 = vector.load %arg5[%c0_12, %c0_13] : memref<1x128xf32, #tpu.memory_space<vmem>>, vector<1x128xf32>
      %14 = vector.broadcast %13 : vector<1x128xf32> to vector<16x128xf32>
      %15 = arith.addf %12, %14 : vector<16x128xf32>
      %c0_14 = arith.constant 0 : index
      %c0_15 = arith.constant 0 : index
      %16 = vector.load %arg6[%c0_14, %c0_15] : memref<16x128xf32, #tpu.memory_space<vmem>>, vector<16x128xf32>
      tpu.vector_store %arg6[%c0_14, %c0_15], %15 {strides = array<i32>} : memref<16x128xf32, #tpu.memory_space<vmem>>, vector<16x128xf32>,
    } else {
    }
    return
  }
  func.func @transform_0(%arg0: i32, %arg1: i32, %arg2: i32) -> (i32, i32) {
    %c0_i32 = arith.constant 0 : i32
    return %arg1, %arg2 : i32, i32
  }
  func.func @transform_1(%arg0: i32, %arg1: i32, %arg2: i32) -> (i32, i32) {
    %c0_i32 = arith.constant 0 : i32
    return %arg2, %arg0 : i32, i32
  }
  func.func @transform_2(%arg0: i32, %arg1: i32, %arg2: i32) -> (i32, i32) {
    %c0_i32 = arith.constant 0 : i32
    %c0_i32_0 = arith.constant 0 : i32
    return %c0_i32, %arg0 : i32, i32
  }
  func.func @transform_3(%arg0: i32, %arg1: i32, %arg2: i32) -> (i32, i32) {
    %c0_i32 = arith.constant 0 : i32
    return %arg1, %arg0 : i32, i32
  }
}

</mosaic_0001>

<bundles_post_ra>
// kernel: decoder_forward.3
= control target key start
LH: loop header
LB: loop body
LE: loop exit
PB: predicated region body
PF: predicated region fallthrough
CT: control target
= control target key end

     0   :  { %vm28_vm0 = vcmask 261120   ;;  %s209_s1 = inlined_call_operand.vmem [shape: f32[32,128], index: 1, kind: input, shape index: {}]   ;;  %s210_s0 = inlined_call_operand.vmem [shape: f32[16,32], index: 0, kind: input, shape index: {}]   ;;  %s211_s2 = inlined_call_operand.vmem [shape: f32[1,128], index: 2, kind: input, shape index: {}]   ;;  %s212_s3 = inlined_call_operand.vmem [shape: f32[16,128], index: 3, kind: output, shape index: {}]  }
   0x1   :  { %v24_v0 = vld [vmem:[%s209_s1] sm:$0xff]  ;;  %v25_v1 = vld [vmem:[%s209_s1 + $0x8] sm:$0xff]  ;;  %v26_v2 = vld [vmem:[%s209_s1 + $0x10] sm:$0xff] }
   0x2   :  { %v154_v3 = vpack.c.bf16 %v25_v1, %v24_v0  ;;  %v27_v4 = vld [vmem:[%s209_s1 + $0x18] sm:$0xff]  ;;  %v22_v5 = vld [vmem:[%s210_s0] sm:$0xff]  ;;  %v23_v7 = vld [vmem:[%s210_s0 + $0x8] sm:$0xff] }
   0x3   :  { %v158_v6 = vpack.c.bf16 %v27_v4, %v26_v2  ;;  %151 = vmatprep.mubr.msk.f32.mxu0 %vm28_vm0, %v22_v5  ;;  %v136_v8 = vld [vmem:[%s211_s2] ss:$0 sm:$0xff] }
   0x4   :  { %155 = vmatprep.subr.bf16.mxu0 %v154_v3 }
   0x5   :  { %157 = vmatpush3.bf16.msra.mxu0 %v154_v3 }
   0x6   :  { %159 = vmatprep.subr.bf16.mxu0 %v158_v6 }
   0x9   :  { %161 = vmatpush3.bf16.msra.mxu0 %v158_v6 }
   0xc   :  { %152 = vmatmul.mubr.msk.f32.vlgmr.msra.gmra.mrb[0].mxu0 %vm28_vm0, %v23_v7 }
  0xdf   :  { %v153_v9 = vpop.f32.mrb[0].mxu0 }
  0xe0   :  { %v127_v10 = vadd.f32 %v153_v9, %v136_v8  ;;  %v101_v11 = vpop.f32.mrb[1].mxu0 }
  0xe1   :  { %v126_v12 = vadd.f32 %v136_v8, %v101_v11 }
  0xe2   :  { %129 = vst [vmem:[%s212_s3 + $0x8] sm:$0xff] %v127_v10 }
  0xe3   :  { %128 = vst [vmem:[%s212_s3] sm:$0xff] %v126_v12 }

// kernel: decoder_forward.2
= control target key start
LH: loop header
LB: loop body
LE: loop exit
PB: predicated region body
PF: predicated region fallthrough
CT: control target
= control target key end

     0   :  { %20 = vsyncpa [#allocation4], 0  ;;  %s2347_s29 = smov 0   ;;  %s2349_s30 = smov 0   ;;  %s2675_s0 = inlined_call_operand.vmem [shape: f32[2,8,32], index: 0, kind: input, shape index: {}]   ;;  %s2676_s1 = inlined_call_operand.vmem [shape: f32[2,32,128], index: 1, kind: input, shape index: {}]   ;;  %s2677_s2 = inlined_call_operand.vmem [shape: f32[2,128,32], index: 2, kind: input, shape index: {}]   ;;  %s2678_s3 = inlined_call_operand.vmem [shape: f32[6,32,64], index: 3, kind: input, shape index: {}]   ;;  %s2679_s4 = inlined_call_operand.vmem [shape: f32[2,1,64], index: 4, kind: input, shape index: {}]   ;;  %s2680_s5 = inlined_call_operand.vmem [shape: f32[32,32], index: 5, kind: input, shape index: {}]   ;;  %s2681_s6 = inlined_call_operand.vmem [shape: f32[1,32], index: 6, kind: input, shape index: {}]   ;;  %s2682_s7 = inlined_call_operand.vmem [shape: f32[32,32], index: 7, kind: input, shape index: {}]   ;;  %s2683_s8 = inlined_call_operand.vmem [shape: f32[1,32], index: 8, kind: input, shape index: {}]   ;;  %s2684_s9 = inlined_call_operand.vmem [shape: f32[32,32], index: 9, kind: input, shape index: {}]   ;;  %s2685_s10 = inlined_call_operand.vmem [shape: f32[1,32], index: 10, kind: input, shape index: {}]   ;;  %s2686_s11 = inlined_call_operand.vmem [shape: f32[32,32], index: 11, kind: input, shape index: {}]   ;;  %s2687_s12 = inlined_call_operand.vmem [shape: f32[1,32], index: 12, kind: input, shape index: {}]   ;;  %s2688_s13 = inlined_call_operand.hbm [shape: f32[2,8,128], index: 13, kind: output, shape index: {0}]   ;;  %s2689_s14 = inlined_call_operand.vmem [shape: f32[2,8,32], index: 14, kind: output, shape index: {1}]  }
   0x1   :  { %s2351_s15 = smov 0  }
   0x2 LB: > { %s1733_s16 = sadd.s32 4294967295, %s2262_s15   ;;  %s35_s17 = sadd.s32 1, %s2258_s30  ;;  %s2262_s15 = sphi %s2351_s15, %s26_s15   ;;  %s2258_s30 = sphi %s2349_s30, %s2692_s30   ;;  %s2254_s29 = sphi %s2347_s29, %s2691_s29  }
   0x3   : > { %p36_p0 = scmp.ge.s32.totalorder %s35_s17, 2  ;;  %p1738_p1 = scmp.ge.s32.totalorder %s2262_s15, 1 }
   0x4   : > { %p453_p2 = scmp.lt.s32.totalorder %s2262_s15, 3 }
   0x5   : > { %s2694_s17 = smov (%p36_p0, %s35_s17), 0 }
   0x6   : > { %p454_p3 = pnand %p1738_p1, %p453_p2 }
   0x7   : > { %p1739_p4 = scmp.ne.s32.totalorder (!%p454_p3), %s2254_s29, 0 }
   0x8   : > { %457 = sbr.rel (%p454_p3) target bundleno = 2069 (0x815), region = 72 }
   0xf   : > { %541 = sbr.rel (%p1739_p4) target bundleno = 242 (0xf2), region = 76  ;;  %vm542_vm0 = vcmask (!%p1739_p4), 254976   ;;  %v547_v0 = vld [vmem:[%s2680_s5] sm:$0xff] (!%p1739_p4)  ;;  %v548_v1 = vld [vmem:[%s2680_s5 + $0x8] sm:$0xff] (!%p1739_p4)  ;;  %v549_v2 = vld [vmem:[%s2680_s5 + $0x10] sm:$0xff] (!%p1739_p4)  ;;  %vm558_vm1 = vcmask (!%p1739_p4), 261120  }
  0x10   : > { %v2264_v3 = vmov (!%p1739_p4), 1.0   ;;  %v2036_v4 = vpack.c.bf16 (!%p1739_p4), %v548_v1, %v547_v0  ;;  %v550_v5 = vld [vmem:[%s2680_s5 + $0x18] sm:$0xff] (!%p1739_p4)  ;;  %v545_v6 = vld [vmem:[%s2675_s0] sm:$0xff] (!%p1739_p4)  ;;  %v546_v8 = vld [vmem:[%s2675_s0 + $0x8] sm:$0xff] (!%p1739_p4) }
  0x11   : > { %543 = vst.msk [vmem:[#allocation2] sm:$0x3] (!%p1739_p4), %vm542_vm0, %v2264_v3  ;;  %544 = vst.msk [vmem:[#allocation2 + $0x10] sm:$0x3] (!%p1739_p4), %vm542_vm0, %v2264_v3  ;;  %v2040_v7 = vpack.c.bf16 (!%p1739_p4), %v550_v5, %v549_v2  ;;  %1875 = vmatprep.mubr.msk.f32.mxu0 (!%p1739_p4), %vm558_vm1, %v545_v6  ;;  %v1740_v9 = vld [vmem:[%s2681_s6] ss:$0 sm:$0xff] (!%p1739_p4) }
  0x12   : > { %2037 = vmatprep.subr.bf16.mxu0 (!%p1739_p4), %v2036_v4 }
  0x13   : > { %2039 = vmatpush3.bf16.msra.mxu0 (!%p1739_p4), %v2036_v4 }
  0x14   : > { %2041 = vmatprep.subr.bf16.mxu0 (!%p1739_p4), %v2040_v7 }
  0x17   : > { %2043 = vmatpush3.bf16.msra.mxu0 %v2040_v7 }
  0x1a   : > { %1876 = vmatmul.mubr.msk.f32.vlgmr.msra.gmra.mrb[0].mxu0 %vm558_vm1, %v546_v8 }
  0xed   : > { %v1877_v10 = vpop.f32.mrb[0].mxu0 }
  0xee   : > { %v637_v11 = vadd.f32 %v1877_v10, %v1740_v9  ;;  %v631_v12 = vpop.f32.mrb[1].mxu0 }
  0xef   : > { %v632_v13 = vadd.f32 %v1740_v9, %v631_v12 }
  0xf0   : > { %641 = vst.msk [vmem:[#allocation2 + $0x12] sm:$0xff] %vm558_vm1, %v637_v11 }
  0xf1   : > { %640 = vst.msk [vmem:[#allocation2 + $0x2] sm:$0xff] %vm558_vm1, %v632_v13 }
  0xf2 PF: > { %s1743_s21 = smul.u32 96, %s2254_s29  ;;  %vm662_vm2 = vcmask 261120   ;;  %v947_v38 = vld [vmem:[%s2682_s7] sm:$0xff]  ;;  %v948_v39 = vld [vmem:[%s2682_s7 + $0x8] sm:$0xff]  ;;  %s642_s20 = scalar_lea.vmem %s2679_s4, %s2254_s29  ;;  %v949_v50 = vld [vmem:[%s2682_s7 + $0x10] sm:$0xff]  ;;  %v2265_v55 = vmov 0.0|0.0  }
  0xf3   : > { %v2068_v40 = vpack.c.bf16 %v948_v39, %v947_v38  ;;  %v1760_v41 = vld [vmem:[%s642_s20] ss:$0 sm:$0xff]  ;;  %v950_v51 = vld [vmem:[%s2682_s7 + $0x18] sm:$0xff]  ;;  %s2266_s25 = smov 96   ;;  %v1046_v63 = vld [vmem:[%s2676_s1 + $0x8] sm:$0xff]  ;;  %vm2267_vm3 = vmmov 0  }
  0xf4   : > { %s648_s24 = scalar_lea.vmem %s2678_s3, %s1743_s21  ;;  %v2072_v53 = vpack.c.bf16 %v950_v51, %v949_v50  ;;  %v1045_v62 = vld [vmem:[%s2676_s1] sm:$0xff]  ;;  %v1047_v1 = vld [vmem:[%s2676_s1 + $0x10] sm:$0xff]  ;;  %v1048_v2 = vld [vmem:[%s2676_s1 + $0x18] sm:$0xff]  ;;  %v2268_v4 = vmov 0.0   ;;  %p1771_p5 = scmp.ne.s32.totalorder %s2254_s29, 1 }
  0xf5   : > { %v1745_v15 = vld [vmem:[%s648_s24 + $0x20] sm:$0xff]  ;;  %v1746_v16 = vld [vmem:[%s648_s24 + $0x28] sm:$0xff]  ;;  %v1747_v17 = vld [vmem:[%s648_s24 + $0x30] sm:$0xff]  ;;  %2069 = vmatprep.subr.bf16.mxu1 %v2068_v40  ;;  %v2077_v0 = vpack.c.bf16 %v1046_v63, %v1045_v62  ;;  %v2080_v3 = vpack.c.bf16 %v1048_v2, %v1047_v1 }
  0xf6   : > { %v2044_v18 = vpack.c.bf16 %v1746_v16, %v1745_v15  ;;  %v1748_v19 = vld [vmem:[%s648_s24 + $0x38] sm:$0xff]  ;;  %v649_v21 = vld [vmem:[%s648_s24] sm:$0xff]  ;;  %v650_v22 = vld [vmem:[%s648_s24 + $0x8] sm:$0xff]  ;;  %2071 = vmatpush3.bf16.msra.mxu1 %v2068_v40 }
  0xf7   : > { %v2048_v20 = vpack.c.bf16 %v1748_v19, %v1747_v17  ;;  %v2052_v23 = vpack.c.bf16 %v650_v22, %v649_v21  ;;  %v651_v24 = vld [vmem:[%s648_s24 + $0x10] sm:$0xff]  ;;  %v652_v25 = vld [vmem:[%s648_s24 + $0x18] sm:$0xff]  ;;  %v1754_v29 = vld [vmem:[%s648_s24 + $0x40] sm:$0xff]  ;;  %2073 = vmatprep.subr.bf16.mxu1 %v2072_v53  ;;  %v1199_v22 = vlaneseq }
  0xf8   : > { %v653_v14 = vld [vmem:[#allocation2 + $0x1] sm:$0xff]  ;;  %2045 = vmatprep.subr.bf16.mxu0 %v2044_v18  ;;  %v654_v26 = vld [vmem:[#allocation2 + $0x11] sm:$0xff]  ;;  %v2056_v27 = vpack.c.bf16 %v652_v25, %v651_v24  ;;  %v1763_v5 = vld [vmem:[%s2683_s8] ss:$0 sm:$0xff] }
  0xf9   : > { %1886 = vmatprep.mubr.msk.f32.mxu0 %vm662_vm2, %v653_v14  ;;  %2047 = vmatpush3.bf16.msra.mxu0 %v2044_v18  ;;  %v644_v28 = vld [vmem:[#allocation2] sm:$0xff]  ;;  %v1755_v30 = vld [vmem:[%s648_s24 + $0x48] sm:$0xff]  ;;  %v1756_v32 = vld [vmem:[%s648_s24 + $0x50] sm:$0xff] }
  0xfa   : > { %2049 = vmatprep.subr.bf16.mxu0 %v2048_v20  ;;  %v2060_v31 = vpack.c.bf16 %v1755_v30, %v1754_v29  ;;  %v1757_v33 = vld [vmem:[%s648_s24 + $0x58] sm:$0xff]  ;;  %v645_v34 = vld [vmem:[#allocation2 + $0x10] sm:$0xff]  ;;  %v2401_v36 = vld [vmem:[#allocation2 + $0x2] sm:$0xff]  ;;  %2075 = vmatpush3.bf16.msra.mxu1 %v2072_v53 }
  0xfb   : > { %v2064_v35 = vpack.c.bf16 %v1757_v33, %v1756_v32  ;;  %v2406_v37 = vld [vmem:[#allocation2 + $0x12] sm:$0xff]  ;;  %2076 = vmatprep.subr.bf16.mxu1 %v2265_v55  ;;  %v1039_v8 = vld [vmem:[%s2675_s0] sm:$0xff]  ;;  %v1050_v11 = vld [vmem:[%s2676_s1 + $0x28] sm:$0xff] }
  0xfc   : > { %v1049_v10 = vld [vmem:[%s2676_s1 + $0x20] sm:$0xff]  ;;  %v1051_v16 = vld [vmem:[%s2676_s1 + $0x30] sm:$0xff]  ;;  %v1052_v17 = vld [vmem:[%s2676_s1 + $0x38] sm:$0xff] }
  0xfd   : > { %2051 = vmatpush3.bf16.msra.mxu0 %v2048_v20  ;;  %v2083_v13 = vpack.c.bf16 %v1050_v11, %v1049_v10  ;;  %v1040_v18 = vld [vmem:[%s2675_s0 + $0x8] sm:$0xff]  ;;  %v2086_v19 = vpack.c.bf16 %v1052_v17, %v1051_v16  ;;  %v1222_v30 = vld [vmem:[%s2677_s2] sm:$0xff]  ;;  %v1224_v32 = vld [vmem:[%s2677_s2 + $0x10] sm:$0xff] }
  0xfe   : > { %2053 = vmatprep.subr.bf16.mxu0 %v2052_v23  ;;  %v1239_v38 = vld [vmem:[%s2677_s2 + $0x88] sm:$0xff]  ;;  %v1240_v40 = vld [vmem:[%s2677_s2 + $0x90] sm:$0xff]  ;;  %v1229_v50 = vld [vmem:[%s2677_s2 + $0x38] sm:$0xff] }
  0xff   : > { %v1230_v53 = vld [vmem:[%s2677_s2 + $0x40] sm:$0xff]  ;;  %v1247_v10 = vld [vmem:[%s2677_s2 + $0xc8] sm:$0xff]  ;;  %v1249_v16 = vld [vmem:[%s2677_s2 + $0xd8] sm:$0xff] }
 0x100   : > { %1887 = vmatmul.mubr.msk.f32.vlgmr.msra.gmra.mrb[0].mxu0 %vm662_vm2, %v654_v26  ;;  %v1234_v11 = vld [vmem:[%s2677_s2 + $0x60] sm:$0xff] }
 0x101   : > { %2055 = vmatpush3.bf16.msra.mxu0 %v2052_v23  ;;  %1897 = vmatprep.mubr.msk.f32.mxu0 %vm662_vm2, %v644_v28  ;;  %v1200_v23 = vand.u32 127, %v1199_v22  ;;  %v1251_v22 = vld [vmem:[%s2677_s2 + $0xe8] sm:$0xff] }
 0x102   : > { %2057 = vmatprep.subr.bf16.mxu0 %v2056_v27 }
 0x103   : > { %vm1201_vm4 = vcmp.lt.s32.totalorder %v1200_v23, 16 }
 0x105   : > { %2059 = vmatpush3.bf16.msra.mxu0 %v2056_v27 }
 0x106   : > { %2061 = vmatprep.subr.bf16.mxu0 %v2060_v31 }
 0x108   : > { %1898 = vmatmul.mubr.msk.f32.vlgmr.msra.gmra.mrb[0].mxu0 %vm662_vm2, %v645_v34  ;;  %v1225_v34 = vld [vmem:[%s2677_s2 + $0x18] sm:$0xff] }
 0x109   : > { %2063 = vmatpush3.bf16.msra.mxu0 %v2060_v31  ;;  %1908 = vmatprep.mubr.msk.f32.mxu0 %vm662_vm2, %v2401_v36  ;;  %v1223_v31 = vld [vmem:[%s2677_s2 + $0x8] sm:$0xff] }
 0x10a   : > { %2065 = vmatprep.subr.bf16.mxu0 %v2064_v35  ;;  %v2089_v33 = vpack.c.bf16 %v1223_v31, %v1222_v30 }
 0x10d   : > { %2067 = vmatpush3.bf16.msra.mxu0 %v2064_v35  ;;  %v1238_v35 = vld [vmem:[%s2677_s2 + $0x80] sm:$0xff] }
 0x10e   : > { %2088 = vmatprep.subr.bf16.mxu0 %v2265_v55  ;;  %v2113_v39 = vpack.c.bf16 %v1239_v38, %v1238_v35  ;;  %v1396_v35 = vld [vmem:[%s2684_s9 + $0x10] sm:$0xff]  ;;  %v1397_v38 = vld [vmem:[%s2684_s9 + $0x18] sm:$0xff] }
 0x110   : > { %1909 = vmatmul.mubr.msk.f32.vlgmr.msra.gmra.mrb[0].mxu0 %vm662_vm2, %v2406_v37 }
 0x111   : > { %1976 = vmatprep.mubr.msk.f32.mxu0 %vm2267_vm3, %v2268_v4  ;;  %2090 = vmatpush3.bf16.msra.mxu0 %v2089_v33  ;;  %v1394_v33 = vld [vmem:[%s2684_s9] sm:$0xff] }
 0x112   : > { %2091 = vmatprep.subr.bf16.mxu0 %v2265_v55 }
 0x1e3   : > { %v1910_v42 = vpop.f32.mrb[0].mxu0 }
 0x1e4   : > { %v924_v43 = vadd.f32 %v1910_v42, %v1760_v41  ;;  %v906_v44 = vpop.f32.mrb[1].mxu0  ;;  %v1241_v42 = vld [vmem:[%s2677_s2 + $0x98] sm:$0xff] }
 0x1e5   : > { %v923_v45 = vadd.f32 %v1760_v41, %v906_v44  ;;  %v2092_v41 = vpack.c.bf16 %v1225_v34, %v1224_v32  ;;  %v1227_v44 = vld [vmem:[%s2677_s2 + $0x28] sm:$0xff] }
 0x1e6   : > { %v1762_v46 = vmul.f32 -1.442695, %v924_v43  ;;  %v1395_v34 = vld [vmem:[%s2684_s9 + $0x8] sm:$0xff] }
 0x1e7   : > { %v1761_v47 = vmul.f32 -1.442695, %v923_v45  ;;  %2093 = vmatpush3.bf16.msra.mxu0 %v2092_v41 }
 0x1e8   : > { %2194 = vpow2.f32 %v1762_v46  ;;  %v1242_v46 = vld [vmem:[%s2677_s2 + $0xa0] sm:$0xff]  ;;  %2094 = vmatprep.subr.bf16.mxu0 %v2265_v55 }
 0x1e9   : > { %2196 = vpow2.f32 %v1761_v47  ;;  %v1243_v47 = vld [vmem:[%s2677_s2 + $0xa8] sm:$0xff] }
 0x1ea   : > { %v2119_v51 = vpack.c.bf16 %v1243_v47, %v1242_v46 }
 0x1f2   : > { %v2195_v48 = vpop.eup %2194 }
 0x1f3   : > { %v2197_v49 = vpop.eup %2196  ;;  %v932_v54 = vadd.f32 1.0, %v2195_v48 }
 0x1f4   : > { %v931_v52 = vadd.f32 1.0, %v2197_v49  ;;  %v1228_v49 = vld [vmem:[%s2677_s2 + $0x30] sm:$0xff] }
 0x1f6   : > { %2198 = vrcp.f32 %v931_v52  ;;  %v2098_v52 = vpack.c.bf16 %v1229_v50, %v1228_v49 }
 0x1f7   : > { %2200 = vrcp.f32 %v932_v54  ;;  %v1231_v54 = vld [vmem:[%s2677_s2 + $0x48] sm:$0xff] }
 0x200   : > { %v2199_v56 = vpop.eup %2198 }
 0x201   : > { %939 = vrot.lane.b32.xlu0 %v2199_v56, %s2266_s25  ;;  %v2201_v57 = vpop.eup %2200  ;;  %v2101_v56 = vpack.c.bf16 %v1231_v54, %v1230_v53 }
 0x205   : > { %941 = vrot.lane.b32.xlu0 %v2201_v57, %s2266_s25 }
 0x273   : > { %v940_v58 = vpop.permute.xlu0 %939 }
 0x274   : > { %v2428_v59 = vmul.f32 %v940_v58, %v923_v45  ;;  %v2116_v45 = vpack.c.bf16 %v1241_v42, %v1240_v40 }
 0x276   : > { %1919 = vmatprep.mubr.msk.f32.mxu1 %vm662_vm2, %v2428_v59 }
 0x277   : > { %v942_v60 = vpop.permute.xlu0 %941 }
 0x278   : > { %v2432_v61 = vmul.f32 %v942_v60, %v924_v43  ;;  %v1226_v43 = vld [vmem:[%s2677_s2 + $0x20] sm:$0xff] }
 0x279   : > { %v2095_v48 = vpack.c.bf16 %v1227_v44, %v1226_v43  ;;  %v1768_v44 = vld [vmem:[%s2685_s10] ss:$0 sm:$0xff] }
 0x27a   : > { %1920 = vmatmul.mubr.msk.f32.vlgmr.msra.gmra.mrb[0].mxu1 %vm662_vm2, %v2432_v61 }
 0x27b   : > { %2078 = vmatpush3.bf16.msra.mxu1 %v2077_v0  ;;  %1930 = vmatprep.mubr.msk.f32.mxu1 %vm2267_vm3, %v2268_v4 }
 0x27c   : > { %2079 = vmatprep.subr.bf16.mxu1 %v2265_v55  ;;  %2096 = vmatpush3.bf16.msra.mxu0 %v2095_v48 }
 0x27d   : > { %2097 = vmatprep.subr.bf16.mxu0 %v2265_v55 }
 0x27f   : > { %2081 = vmatpush3.bf16.msra.mxu1 %v2080_v3  ;;  %v1244_v3 = vld [vmem:[%s2677_s2 + $0xb0] sm:$0xff] }
 0x280   : > { %2082 = vmatprep.subr.bf16.mxu1 %v2265_v55  ;;  %2099 = vmatpush3.bf16.msra.mxu0 %v2098_v52 }
 0x281   : > { %2100 = vmatprep.subr.bf16.mxu0 %v2265_v55 }
 0x284   : > { %2102 = vmatpush3.bf16.msra.mxu0 %v2101_v56 }
 0x285   : > { %2103 = vmatprep.subr.bf16.mxu0 %v2265_v55 }
 0x34d   : > { %v1921_v6 = vpop.f32.mrb[0].mxu1 }
 0x34e   : > { %v1030_v7 = vpop.f32.mrb[1].mxu1  ;;  %v1036_v14 = vadd.f32 %v1921_v6, %v1763_v5  ;;  %v1232_v6 = vld [vmem:[%s2677_s2 + $0x50] sm:$0xff] }
 0x34f   : > { %v1031_v9 = vadd.f32 %v1763_v5, %v1030_v7  ;;  %v1233_v7 = vld [vmem:[%s2677_s2 + $0x58] sm:$0xff] }
 0x350   : > { %v1042_v20 = vadd.f32 %v1040_v18, %v1036_v14  ;;  %v1236_v18 = vld [vmem:[%s2677_s2 + $0x70] sm:$0xff] }
 0x351   : > { %v1041_v12 = vadd.f32 %v1039_v8, %v1031_v9  ;;  %v1246_v8 = vld [vmem:[%s2677_s2 + $0xc0] sm:$0xff]  ;;  %v2104_v9 = vpack.c.bf16 %v1233_v7, %v1232_v6 }
 0x352   : > { %v1044_v21 = vmul.f32 0.70710677, %v1042_v20 }
 0x353   : > { %v1043_v15 = vmul.f32 0.70710677, %v1041_v12  ;;  %v1235_v12 = vld [vmem:[%s2677_s2 + $0x68] sm:$0xff]  ;;  %2105 = vmatpush3.bf16.msra.mxu0 %v2104_v9 }
 0x354   : > { %v2107_v14 = vpack.c.bf16 %v1235_v12, %v1234_v11  ;;  %2106 = vmatprep.subr.bf16.mxu0 %v2265_v55 }
 0x355   : > { %1931 = vmatmul.mubr.msk.f32.vlgmr.msra.gmra.mrb[2].mxu1 %vm662_vm2, %v1043_v15  ;;  %v1248_v15 = vld [vmem:[%s2677_s2 + $0xd0] sm:$0xff] }
 0x356   : > { %2084 = vmatpush3.bf16.msra.mxu1 %v2083_v13  ;;  %1941 = vmatprep.mubr.msk.f32.mxu1 %vm2267_vm3, %v2268_v4  ;;  %v2125_v13 = vpack.c.bf16 %v1247_v10, %v1246_v8  ;;  %v2128_v17 = vpack.c.bf16 %v1249_v16, %v1248_v15 }
 0x357   : > { %2085 = vmatprep.subr.bf16.mxu1 %v2265_v55  ;;  %2108 = vmatpush3.bf16.msra.mxu0 %v2107_v14 }
 0x358   : > { %2109 = vmatprep.subr.bf16.mxu0 %v2265_v55 }
 0x35a   : > { %2087 = vmatpush3.bf16.msra.mxu1 %v2086_v19  ;;  %v1237_v19 = vld [vmem:[%s2677_s2 + $0x78] sm:$0xff] }
 0x35b   : > { %2112 = vmatprep.subr.bf16.mxu1 %v2265_v55  ;;  %v2110_v20 = vpack.c.bf16 %v1237_v19, %v1236_v18 }
 0x35d   : > { %1942 = vmatmul.mubr.msk.f32.vlgmr.msra.gmra.mrb[4].mxu1 %vm662_vm2, %v1044_v21  ;;  %2111 = vmatpush3.bf16.msra.mxu0 %v2110_v20  ;;  %v1250_v21 = vld [vmem:[%s2677_s2 + $0xe0] sm:$0xff] }
 0x35e   : > { %2011 = vmatprep.mubr.msk.f32.mxu1 %vm2267_vm3, %v2268_v4  ;;  %2114 = vmatpush3.bf16.msra.mxu1 %v2113_v39  ;;  %v1245_v4 = vld [vmem:[%s2677_s2 + $0xb8] sm:$0xff]  ;;  %v2131_v23 = vpack.c.bf16 %v1251_v22, %v1250_v21  ;;  %v2140_v39 = vpack.c.bf16 %v1397_v38, %v1396_v35 }
 0x35f   : > { %2115 = vmatprep.subr.bf16.mxu1 %v2265_v55  ;;  %v2122_v5 = vpack.c.bf16 %v1245_v4, %v1244_v3 }
 0x362   : > { %2117 = vmatpush3.bf16.msra.mxu1 %v2116_v45 }
 0x363   : > { %2118 = vmatprep.subr.bf16.mxu1 %v2265_v55 }
 0x366   : > { %2120 = vmatpush3.bf16.msra.mxu1 %v2119_v51 }
 0x367   : > { %2121 = vmatprep.subr.bf16.mxu1 %v2265_v55 }
 0x36a   : > { %2123 = vmatpush3.bf16.msra.mxu1 %v2122_v5 }
 0x36b   : > { %2124 = vmatprep.subr.bf16.mxu1 %v2265_v55 }
 0x36e   : > { %2126 = vmatpush3.bf16.msra.mxu1 %v2125_v13 }
 0x36f   : > { %2127 = vmatprep.subr.bf16.mxu1 %v2265_v55 }
 0x372   : > { %2129 = vmatpush3.bf16.msra.mxu1 %v2128_v17 }
 0x373   : > { %2130 = vmatprep.subr.bf16.mxu1 %v2265_v55 }
 0x376   : > { %2132 = vmatpush3.bf16.msra.mxu1 %v2131_v23 }
 0x377   : > { %2133 = vmatprep.subr.bf16.mxu1 %v2265_v55  ;;  %v2136_v55 = vpack.c.bf16 %v1395_v34, %v1394_v33 }
 0x379   : > { %2137 = vmatprep.subr.bf16.mxu0 %v2136_v55 }
 0x428   : > { %v1122_v24 = vpop.f32.mrb[2].mxu1 }
 0x429   : > { %v1932_v25 = vpop.f32.mrb[3].mxu1  ;;  %v1202_v26 = vsel %vm1201_vm4, %v1122_v24, -1e+30  ;;  %v1252_v24 = vld [vmem:[%s2677_s2 + $0xf0] sm:$0xff] }
 0x42a   : > { %1204 = vmax.xlane.f32.xlu1 %v1202_v26  ;;  %v1253_v25 = vld [vmem:[%s2677_s2 + $0xf8] sm:$0xff] }
 0x430   : > { %v1195_v27 = vpop.f32.mrb[4].mxu1 }
 0x431   : > { %v1943_v28 = vpop.f32.mrb[5].mxu1  ;;  %v1203_v29 = vsel %vm1201_vm4, %v1195_v27, -1e+30 }
 0x432   : > { %1206 = vmax.xlane.f32.xlu1 %v1203_v29 }
 0x4b7   : > { %v1205_v57 = vpop.xlane.xlu1 %1204 }
 0x4b8   : > { %v1208_v58 = vsub.f32 %v1202_v26, %v1205_v57  ;;  %v2134_v26 = vpack.c.bf16 %v1253_v25, %v1252_v24 }
 0x4ba   : > { %v1210_v60 = vmul.f32 1.442695, %v1208_v58  ;;  %2135 = vmatpush3.bf16.msra.mxu1 %v2134_v26  ;;  %v1505_v58 = vld [vmem:[%s2686_s11 + $0x18] sm:$0xff] (!%p1771_p5) }
 0x4bc   : > { %2202 = vpow2.f32 %v1210_v60 }
 0x4bf   : > { %v1207_v62 = vpop.xlane.xlu1 %1206 }
 0x4c0   : > { %v1209_v63 = vsub.f32 %v1203_v29, %v1207_v62  ;;  %v1772_v62 = vld [vmem:[%s2687_s12] ss:$0 sm:$0xff] (!%p1771_p5) }
 0x4c2   : > { %v1212_v0 = vmul.f32 1.442695, %v1209_v63 }
 0x4c4   : > { %2204 = vpow2.f32 %v1212_v0 }
 0x4c6   : > { %v2203_v1 = vpop.eup %2202 }
 0x4c7   : > { %1214 = vadd.xlane.f32.xlu0 %v2203_v1 }
 0x4ce   : > { %v2205_v2 = vpop.eup %2204 }
 0x4cf   : > { %1216 = vadd.xlane.f32.xlu1 %v2205_v2 }
 0x554   : > { %v1215_v27 = vpop.xlane.xlu0 %1214 }
 0x555   : > { %2206 = vrcp.f32 %v1215_v27 }
 0x55c   : > { %v1217_v28 = vpop.xlane.xlu1 %1216 }
 0x55d   : > { %2208 = vrcp.f32 %v1217_v28 }
 0x55f   : > { %v2207_v29 = vpop.eup %2206 }
 0x560   : > { %v1220_v30 = vmul.f32 %v2207_v29, %v2203_v1 }
 0x562   : > { %1977 = vmatmul.mubr.f32.vlgmr.msra.gmra.mrb[2].mxu0 %v1220_v30  ;;  %1500 = vst [vmem:[#allocation3] sm:$0xff] (!%p1771_p5), %v1220_v30 }
 0x563   : > { %2139 = vmatpush3.bf16.msra.mxu0 %v2136_v55 }
 0x564   : > { %2141 = vmatprep.subr.bf16.mxu0 %v2140_v39 }
 0x567   : > { %v2209_v31 = vpop.eup %2208  ;;  %2143 = vmatpush3.bf16.msra.mxu0 %v2140_v39 }
 0x568   : > { %v1221_v32 = vmul.f32 %v2209_v31, %v2205_v2 }
 0x56a   : > { %2012 = vmatmul.mubr.f32.vlgmr.msra.gmra.mrb[6].mxu1 %v1221_v32  ;;  %1501 = vst [vmem:[#allocation3 + $0x8] sm:$0xff] (!%p1771_p5), %v1221_v32 }
 0x635   : > { %v1320_v40 = vpop.f32.mrb[2].mxu0 }
 0x636   : > { %v1978_v41 = vpop.f32.mrb[3].mxu0  ;;  %2022 = vmatprep.mubr.msk.f32.mxu0 %vm662_vm2, %v1320_v40 }
 0x63d   : > { %v1390_v42 = vpop.f32.mrb[6].mxu1 }
 0x63e   : > { %v2013_v43 = vpop.f32.mrb[7].mxu1  ;;  %2023 = vmatmul.mubr.msk.f32.vlgmr.msra.gmra.mrb[4].mxu0 %vm662_vm2, %v1390_v42 }
 0x711   : > { %v2024_v45 = vpop.f32.mrb[4].mxu0 }
 0x712   : > { %v1483_v46 = vadd.f32 %v2024_v45, %v1768_v44  ;;  %v1477_v47 = vpop.f32.mrb[5].mxu0 }
 0x713   : > { %v1478_v48 = vadd.f32 %v1768_v44, %v1477_v47 }
 0x714   : > { %v1487_v49 = vadd.f32 %v1483_v46, %v2432_v61 }
 0x715   : > { %v1486_v50 = vadd.f32 %v1478_v48, %v2428_v59  ;;  %v1502_v59 = vld [vmem:[%s2686_s11] sm:$0xff] (!%p1771_p5) }
 0x716   : > { %v1489_v51 = vmul.f32 0.70710677, %v1487_v49 }
 0x717   : > { %v1488_v52 = vmul.f32 0.70710677, %v1486_v50  ;;  %1499 = sbr.rel (%p1771_p5) target bundleno = 2043 (0x7fb), region = 80 }
 0x718   : > { %v1491_v53 = vadd.f32 %v1489_v51, %v2406_v37  ;;  %v1503_v37 = vld [vmem:[%s2686_s11 + $0x8] sm:$0xff] (!%p1771_p5) }
 0x719   : > { %v1490_v54 = vadd.f32 %v1488_v52, %v2401_v36  ;;  %v1504_v36 = vld [vmem:[%s2686_s11 + $0x10] sm:$0xff] (!%p1771_p5)  ;;  %v2144_v61 = vpack.c.bf16 (!%p1771_p5), %v1503_v37, %v1502_v59 }
 0x71a   : > { %v1493_v56 = vmul.f32 0.70710677, %v1491_v53  ;;  %v2148_v60 = vpack.c.bf16 (!%p1771_p5), %v1505_v58, %v1504_v36 }
 0x71b   : > { %v1492_v57 = vmul.f32 0.70710677, %v1490_v54  ;;  %2145 = vmatprep.subr.bf16.mxu0 (!%p1771_p5), %v2144_v61 }
 0x71c   : > { %1495 = vst.msk [vmem:[#allocation2 + $0x12] sm:$0xff] %vm662_vm2, %v1493_v56  ;;  %2147 = vmatpush3.bf16.msra.mxu0 (!%p1771_p5), %v2144_v61 }
 0x71d   : > { %1494 = vst.msk [vmem:[#allocation2 + $0x2] sm:$0xff] %vm662_vm2, %v1492_v57  ;;  %2033 = vmatprep.mubr.msk.f32.mxu0 (!%p1771_p5), %vm662_vm2, %v1492_v57  ;;  %2149 = vmatprep.subr.bf16.mxu0 (!%p1771_p5), %v2148_v60 }
 0x720   : > { %2151 = vmatpush3.bf16.msra.mxu0 %v2148_v60 }
 0x723   : > { %2034 = vmatmul.mubr.msk.f32.vlgmr.msra.gmra.mrb[0].mxu0 %vm662_vm2, %v1493_v56 }
 0x7f6   : > { %v2035_v63 = vpop.f32.mrb[0].mxu0 }
 0x7f7   : > { %v1591_v0 = vadd.f32 %v2035_v63, %v1772_v62  ;;  %v1585_v1 = vpop.f32.mrb[1].mxu0 }
 0x7f8   : > { %v1586_v2 = vadd.f32 %v1772_v62, %v1585_v1 }
 0x7f9   : > { %1595 = vst.msk [vmem:[%s2689_s14 + $0x8] sm:$0xff] %vm662_vm2, %v1591_v0 }
 0x7fa   : > { %1594 = vst.msk [vmem:[%s2689_s14] sm:$0xff] %vm662_vm2, %v1586_v2 }
 0x7fb PF: > { %p2640_p6 = scmp.eq.s32.totalorder %s1733_s16, 1  ;;  %s2269_s26 = smov [#allocation3]  }
 0x7fc   : > { %s1610_s27 = sshll.u32 %s2269_s26, 4  ;;  %s1611_s27 = int_to_ptr.vmem [resolvable:$true] %s1610_s27 }
 0x7fd   : > { %s2210_s28 = scalar_lea.vmem %s1611_s27, 256  ;;  %p2217_p10 = scmp.lt.s32.totalorder %s1611_s27, %s1611_s27 }
 0x7fe   : > { %p2211_p7 = scmp.ne.s32.totalorder %s1611_s27, %s2210_s28  ;;  %p2218_p11 = scmp.lt.s32.totalorder %s2210_s28, %s2210_s28 }
 0x800   : > { %p2212_p8 = pnand %p2211_p7, %p2640_p6  ;;  %p2219_p12 = por %p2218_p11, %p2217_p10 }
 0x802   : > { %p2213_p9 = pneg %p2212_p8 }
 0x804   : > { %p2220_p13 = pnand %p2219_p12, %p2213_p9 }
 0x806   : > { %2223 = shalt.err (!%p2220_p13)
}
 0x807   : > { %s2224_s16 = scalar_lea.hbm %s2688_s13, 256 }
 0x808   : > { %p2225_p0 = scmp.ne.s32.totalorder %s2688_s13, %s2224_s16  ;;  %p2230_p3 = scmp.lt.u32.totalorder %s2224_s16, %s2688_s13 }
 0x80a   : > { %p2226_p1 = pnand %p2225_p0, %p2640_p6 }
 0x80c   : > { %p2227_p2 = pneg %p2226_p1 }
 0x80e   : > { %p2232_p4 = pnand %p2230_p3, %p2227_p2 }
 0x810   : > { %2235 = shalt.err (!%p2232_p4)
}
 0x811   : > { %s2270_s23 = smov 128   ;;  %s2271_s24 = smov 8  }
 0x812   : > { %2157 = dma.vmem_to_hbm [thread:$0]  (%p2640_p6), %s1611_s27, 256, %s2688_s13, [#allocation4], %s2270_s23, %s2270_s23, %s2271_s24  }
 0x813   : > { %2249 = dma.done.wait (%p2640_p6), [#allocation4], 256  }
 0x814   : > { %2251 = vsyncadd (%p2640_p6), [#allocation4], 4294967040 }
 0x815 PF: > { %s26_s15 = sadd.s32 1, %s2262_s15   ;;  %s2691_s29 = smov %s2258_s30 }
 0x816   : > { %p23_p5 = scmp.ge.s32.totalorder %s26_s15, 4   ;;  %s2692_s30 = smov %s2694_s17 }
 0x818   :  { %25 = sbr.rel (!%p23_p5) target bundleno = 2 (0x2), region = 130 }
 0x81f   :  { %1638 = vsyncpa [#allocation4], 1 }
 0x820   :  { %1640 = vsyncpa [#allocation4 + $0x1], 1 }

</bundles_post_ra>
